<compile_context>
chip_gen: v6e
topology: v6e:2x2x1
jax: 0.10.0
libtpu: 0.0.40
codegen_flags: <defaults>
</compile_context>

<pallas_src>
import functools
import math

import jax
import jax.numpy as jnp
from jax.experimental import pallas as pl
from jax.experimental.pallas import tpu as pltpu

IN_FEATURES = 500
N_PAD = 128          # lane-dense padded logits width (multiple of 128)


# ---------------- Pallas kernel ----------------
def linear_kernel(x_ref, w_ref, b_ref, o_ref):
    # x_ref: (tm, 500)  w_ref: (500, 128)  b_ref: (1, 128)  o_ref: (tm, 128)
    o_ref[...] = (
        jnp.dot(x_ref[...], w_ref[...], preferred_element_type=jnp.float32)
        + b_ref[...]
    )


# ---------------- hoisted (once-per-model) parameter prep ----------------
def prepare_params(weight, bias):
    """weight: (n_output, 500), bias: (n_output,)  ->  (w_t, b_p, n_output).

    Transposes and zero-pads to a lane-dense (500, 128) slab + (1, 128) bias.
    Do this ONCE per model; the padded columns are zero so the real logits are
    bit-identical to x @ W.T + b.
    """
    n_output, k = weight.shape
    assert k == IN_FEATURES, (k, IN_FEATURES)
    assert n_output <= N_PAD, n_output
    w_t = jnp.zeros((k, N_PAD), jnp.float32).at[:, :n_output].set(
        weight.T.astype(jnp.float32))
    b_p = jnp.zeros((1, N_PAD), jnp.float32).at[0, :n_output].set(
        bias.astype(jnp.float32))
    return w_t, b_p, n_output


def _pick_tm(B: int) -> int:
    """Row tile: large enough that each grid step is HBM-bound (not per-step
    overhead bound), while keeping >= 2 grid steps for non-tiny batches so the
    two v7x TensorCores both get work.  Always a multiple of 8 when tiling, or
    the full batch dim for tiny batches (block == full dim is always legal)."""
    if B <= 8:
        return B                                   # single tile
    if B <= 2048:
        return 8 * pl.cdiv(pl.cdiv(B, 2), 8)       # ~half the batch, mult. of 8
    return 1024                                    # roofline gain saturates here


# ---------------- forward ----------------
@functools.partial(jax.jit, static_argnames=("n_output",))
def classifier_u2m_forward(x, w_t, b_p, n_output):
    """x: (B, 500) f32, (w_t, b_p, n_output) from prepare_params.

    Returns (B, n_output) f32 == x @ weight.T + bias.
    """
    B, K = x.shape
    assert K == IN_FEATURES, K

    tm = _pick_tm(B)
    grid = pl.cdiv(B, tm)   # no explicit batch pad: Pallas masks the last tile

    out = pl.pallas_call(
        linear_kernel,
        out_shape=jax.ShapeDtypeStruct((B, N_PAD), jnp.float32),
        grid_spec=pltpu.PrefetchScalarGridSpec(
            num_scalar_prefetch=0,
            grid=(grid,),
            in_specs=[
                pl.BlockSpec((tm, K), lambda i: (i, 0)),       # x row tile
                pl.BlockSpec((K, N_PAD), lambda i: (0, 0)),    # weight (resident)
                pl.BlockSpec((1, N_PAD), lambda i: (0, 0)),    # bias (resident)
            ],
            out_specs=pl.BlockSpec((tm, N_PAD), lambda i: (i, 0)),
        ),
        compiler_params=pltpu.CompilerParams(
            dimension_semantics=("parallel",),     # batch rows independent
            vmem_limit_bytes=32 * 1024 * 1024,     # tm=1024 double-buffered fits
        ),
    )(x.astype(jnp.float32), w_t, b_p)

    # Slice away the lane padding.  Under jit this fuses with the consumer;
    # callers that can consume 128-wide logits may skip it entirely.
    return out[:, :n_output]


# ---------------- deterministic parameter init (matches nn.Linear defaults) ----------------
def make_params(key, n_output):
    bound = 1.0 / math.sqrt(IN_FEATURES)
    kw, kb = jax.random.split(key)
    weight = jax.random.uniform(kw, (n_output, IN_FEATURES), jnp.float32, -bound, bound)
    bias = jax.random.uniform(kb, (n_output,), jnp.float32, -bound, bound)
    return weight, bias


# ---------------- pure-JAX reference ----------------
def reference_forward(x, weight, bias):
    return x @ weight.T + bias


if __name__ == "__main__":
    key = jax.random.PRNGKey(0)
    kx, kp = jax.random.split(key)

    B, n_output = 2, 10
    x = jax.random.normal(kx, (B, IN_FEATURES), jnp.float32)
    weight, bias = make_params(kp, n_output)

    # Hoisted once-per-model prep (perf review item #3).
    w_t, b_p, n_out = prepare_params(weight, bias)

    out = jax.block_until_ready(classifier_u2m_forward(x, w_t, b_p, n_out))
    ref = reference_forward(x, weight, bias)

    assert out.shape == (B, n_output), out.shape
    assert jnp.allclose(out, ref, atol=1e-5, rtol=1e-5), (out, ref)

    # Also exercise a batch that is not a multiple of the row tile
    # (checks the no-pad, masked-boundary path).
    B2 = 37
    x2 = jax.random.normal(kx, (B2, IN_FEATURES), jnp.float32)
    out2 = jax.block_until_ready(classifier_u2m_forward(x2, w_t, b_p, n_out))
    ref2 = reference_forward(x2, weight, bias)
    assert out2.shape == (B2, n_output), out2.shape
    assert jnp.allclose(out2, ref2, atol=1e-5, rtol=1e-5)

    print("KERNEL_OK")
</pallas_src>

<mosaic_0001>
module attributes {stable_mosaic.version = 11 : i64} {
  func.func @linear_kernel(%arg0: i32, %arg1: memref<2x500xf32, #tpu.memory_space<vmem>>, %arg2: memref<500x128xf32, #tpu.memory_space<vmem>>, %arg3: memref<1x128xf32, #tpu.memory_space<vmem>>, %arg4: memref<2x128xf32, #tpu.memory_space<vmem>>) attributes {dimension_semantics = [#tpu.dimension_semantics<parallel>], iteration_bounds = array<i64: 1>, scalar_prefetch = 0 : i64, scratch_operands = 0 : i64, tpu.core_type = #tpu.core_type<tc>, window_params = [{transform_indices = @transform_0, window_bounds = array<i64: 2, 500>}, {pipeline_mode = #tpu.pipeline_mode<synchronous>, transform_indices = @transform_1, window_bounds = array<i64: 500, 128>}, {pipeline_mode = #tpu.pipeline_mode<synchronous>, transform_indices = @transform_2, window_bounds = array<i64: 1, 128>}, {transform_indices = @transform_3, window_bounds = array<i64: 2, 128>}]} {
    %c0 = arith.constant 0 : index
    %c0_0 = arith.constant 0 : index
    %0 = vector.load %arg1[%c0, %c0_0] : memref<2x500xf32, #tpu.memory_space<vmem>>, vector<2x500xf32>
    %c0_1 = arith.constant 0 : index
    %c0_2 = arith.constant 0 : index
    %1 = vector.load %arg2[%c0_1, %c0_2] : memref<500x128xf32, #tpu.memory_space<vmem>>, vector<500x128xf32>
    %cst = arith.constant dense<0.000000e+00> : vector<2x128xf32>
    %2 = tpu.matmul %0, %1, %cst {dimension_numbers = #tpu.dot_dimension_numbers<[1], [0], [0], [1], [0, 0, 1, 1], [], []>} : vector<2x500xf32>, vector<500x128xf32>, vector<2x128xf32> -> vector<2x128xf32>
    %c0_3 = arith.constant 0 : index
    %c0_4 = arith.constant 0 : index
    %3 = vector.load %arg3[%c0_3, %c0_4] : memref<1x128xf32, #tpu.memory_space<vmem>>, vector<1x128xf32>
    %4 = vector.broadcast %3 : vector<1x128xf32> to vector<2x128xf32>
    %5 = arith.addf %2, %4 : vector<2x128xf32>
    %c0_5 = arith.constant 0 : index
    %c0_6 = arith.constant 0 : index
    %6 = vector.load %arg4[%c0_5, %c0_6] : memref<2x128xf32, #tpu.memory_space<vmem>>, vector<2x128xf32>
    tpu.vector_store %arg4[%c0_5, %c0_6], %5 {strides = array<i32>} : memref<2x128xf32, #tpu.memory_space<vmem>>, vector<2x128xf32>,
    return
  }
  func.func @transform_0(%arg0: i32) -> (i32, i32) {
    %c0_i32 = arith.constant 0 : i32
    %c0_i32_0 = arith.constant 0 : i32
    return %arg0, %c0_i32 : i32, i32
  }
  func.func @transform_1(%arg0: i32) -> (i32, i32) {
    %c0_i32 = arith.constant 0 : i32
    %c0_i32_0 = arith.constant 0 : i32
    %c0_i32_1 = arith.constant 0 : i32
    return %c0_i32, %c0_i32_0 : i32, i32
  }
  func.func @transform_2(%arg0: i32) -> (i32, i32) {
    %c0_i32 = arith.constant 0 : i32
    %c0_i32_0 = arith.constant 0 : i32
    %c0_i32_1 = arith.constant 0 : i32
    return %c0_i32, %c0_i32_0 : i32, i32
  }
  func.func @transform_3(%arg0: i32) -> (i32, i32) {
    %c0_i32 = arith.constant 0 : i32
    %c0_i32_0 = arith.constant 0 : i32
    return %arg0, %c0_i32 : i32, i32
  }
}

</mosaic_0001>

<bundles_post_ra>
// kernel: classifier_u2m_forward.1
= control target key start
LH: loop header
LB: loop body
LE: loop exit
PB: predicated region body
PF: predicated region fallthrough
CT: control target
= control target key end

     0   :  { %8 = vsyncpa [#allocation3], 0  ;;  %s479_s0 = inlined_call_operand.hbm [shape: f32[2,500], index: 0, kind: input, shape index: {}]   ;;  %s480_s1 = inlined_call_operand.hbm [shape: f32[500,128], index: 1, kind: input, shape index: {}]   ;;  %s481_s2 = inlined_call_operand.vmem [shape: f32[1,128], index: 2, kind: input, shape index: {}]   ;;  %s482_s3 = inlined_call_operand.hbm [shape: f32[2,128], index: 3, kind: output, shape index: {}]  }
   0x1   :  { %9 = vsyncpa [#allocation6], 0 }
   0x2   :  { %10 = vsyncpa [#allocation4], 0  ;;  %s409_s12 = smov [#allocation2]   ;;  %s410_s14 = smov [#allocation5]  }
   0x3   :  { %s17_s13 = sshll.u32 %s409_s12, 4  ;;  %s26_s15 = sshll.u32 %s410_s14, 4  ;;  %s18_s13 = int_to_ptr.vmem [resolvable:$true] %s17_s13  ;;  %s27_s15 = int_to_ptr.vmem [resolvable:$true] %s26_s15 }
   0x4   :  { %s351_s16 = scalar_lea.vmem %s18_s13, 128  ;;  %p356_p1 = scmp.lt.s32.totalorder %s18_s13, %s18_s13 }
   0x5   :  { %p352_p0 = scmp.ne.s32.totalorder %s18_s13, %s351_s16  ;;  %p357_p2 = scmp.lt.s32.totalorder %s351_s16, %s351_s16 }
   0x7   :  { %p358_p3 = por %p357_p2, %p356_p1 }
   0x9   :  { %p359_p4 = pnand %p358_p3, %p352_p0 }
   0xb   :  { %362 = shalt.err (!%p359_p4)
}
   0xc   :  { %20 = dma.hbm_to_vmem [thread:$0]  %s479_s0, 128, %s18_s13, [#allocation3]  }
   0xd   :  { %s371_s19 = scalar_lea.vmem %s27_s15, 8064  ;;  %p376_p6 = scmp.lt.s32.totalorder %s27_s15, %s27_s15 }
   0xe   :  { %p372_p5 = scmp.ne.s32.totalorder %s27_s15, %s371_s19  ;;  %p377_p7 = scmp.lt.s32.totalorder %s371_s19, %s371_s19 }
  0x10   :  { %p378_p8 = por %p377_p7, %p376_p6 }
  0x12   :  { %p379_p9 = pnand %p378_p8, %p372_p5 }
  0x14   :  { %382 = shalt.err (!%p379_p9)
}
  0x15   :  { %s411_s20 = smov 128   ;;  %s412_s21 = smov 8  }
  0x16   :  { %32 = dma.hbm_to_vmem [thread:$0]  %s480_s1, 8064, %s27_s15, [#allocation6], %s411_s20, %s411_s20, %s412_s21  }
  0x17   :  { %403 = dma.done.wait [#allocation3], 128  }
  0x18   :  { %404 = vsyncadd [#allocation3], 4294967168 }
  0x19   :  { %405 = dma.done.wait [#allocation6], 8064  }
  0x1a   :  { %406 = vsyncadd [#allocation6], 4294959232  ;;  %v413_v0 = vmov 0.0   ;;  %v89_v1 = vld [vmem:[#allocation5 + $0x178] sm:$0xff]  ;;  %v88_v2 = vld [vmem:[#allocation5 + $0x170] sm:$0xff]  ;;  %v117_v29 = vlaneseq  ;;  %vm136_vm0 = vcmask 1043456  }
  0x1b   :  { %210 = vmatprep.subr.mxu1 %v413_v0  ;;  %v87_v3 = vld [vmem:[#allocation5 + $0x168] sm:$0xff]  ;;  %v73_v4 = vld [vmem:[#allocation5 + $0xf8] sm:$0xff]  ;;  %v86_v5 = vld [vmem:[#allocation5 + $0x160] sm:$0xff]  ;;  %v414_v27 = vmov 1983009808   ;;  %vm133_vm1 = vcmask 949248  }
  0x1c   :  { %211 = vmatpush1.msra.mxu1 %v89_v1  ;;  %300 = vmatprep.subr.mxu0 %v73_v4  ;;  %v57_v6 = vld [vmem:[#allocation5 + $0x78] sm:$0xff]  ;;  %v72_v7 = vld [vmem:[#allocation5 + $0xf0] sm:$0xff]  ;;  %v71_v9 = vld [vmem:[#allocation5 + $0xe8] sm:$0xff]  ;;  %v115_v28 = vunpack.c.l.s4 %v414_v27  ;;  %v118_v37 = vshrl.u32 %v117_v29, 7  ;;  %s415_s24 = smov [#allocation7]  }
  0x1d   :  { %212 = vmatprep.subr.mxu1 %v413_v0  ;;  %301 = vmatpush3.msra.mxu0 %v57_v6  ;;  %v56_v8 = vld [vmem:[#allocation5 + $0x70] sm:$0xff]  ;;  %v85_v10 = vld [vmem:[#allocation5 + $0x158] sm:$0xff]  ;;  %v55_v11 = vld [vmem:[#allocation5 + $0x68] sm:$0xff]  ;;  %s287_s25 = sshll.u32 %s415_s24, 4  ;;  %s288_s25 = int_to_ptr.vmem [resolvable:$true] %s287_s25 }
  0x1e   :  { %213 = vmatpush1.msra.mxu1 %v88_v2  ;;  %302 = vmatprep.subr.mxu0 %v72_v7  ;;  %v70_v12 = vld [vmem:[#allocation5 + $0xe0] sm:$0xff]  ;;  %v84_v13 = vld [vmem:[#allocation5 + $0x150] sm:$0xff]  ;;  %v69_v15 = vld [vmem:[#allocation5 + $0xd8] sm:$0xff]  ;;  %v116_v36 = vunpack.c.0.s8 %v115_v28  ;;  %s383_s26 = scalar_lea.vmem %s288_s25, 32  ;;  %p388_p11 = scmp.lt.s32.totalorder %s288_s25, %s288_s25 }
  0x1f   :  { %214 = vmatprep.subr.mxu1 %v413_v0  ;;  %303 = vmatpush3.msra.mxu0 %v56_v8  ;;  %v54_v14 = vld [vmem:[#allocation5 + $0x60] sm:$0xff]  ;;  %v83_v16 = vld [vmem:[#allocation5 + $0x148] sm:$0xff]  ;;  %v53_v17 = vld [vmem:[#allocation5 + $0x58] sm:$0xff]  ;;  %p384_p10 = scmp.ne.s32.totalorder %s288_s25, %s383_s26  ;;  %p389_p12 = scmp.lt.s32.totalorder %s383_s26, %s383_s26 }
  0x20   :  { %215 = vmatpush1.msra.mxu1 %v87_v3  ;;  %304 = vmatprep.subr.mxu0 %v71_v9  ;;  %v68_v18 = vld [vmem:[#allocation5 + $0xd0] sm:$0xff]  ;;  %v82_v19 = vld [vmem:[#allocation5 + $0x140] sm:$0xff]  ;;  %v67_v21 = vld [vmem:[#allocation5 + $0xc8] sm:$0xff]  ;;  %v119_v44 = vsub.s32 %v116_v36, %v118_v37 }
  0x21   :  { %216 = vmatprep.subr.mxu1 %v413_v0  ;;  %305 = vmatpush3.msra.mxu0 %v55_v11  ;;  %v52_v20 = vld [vmem:[#allocation5 + $0x50] sm:$0xff]  ;;  %v81_v22 = vld [vmem:[#allocation5 + $0x138] sm:$0xff]  ;;  %v51_v23 = vld [vmem:[#allocation5 + $0x48] sm:$0xff]  ;;  %p390_p13 = por %p389_p12, %p388_p11 }
  0x22   :  { %217 = vmatpush1.msra.mxu1 %v86_v5  ;;  %306 = vmatprep.subr.mxu0 %v70_v12  ;;  %v66_v24 = vld [vmem:[#allocation5 + $0xc0] sm:$0xff]  ;;  %v80_v25 = vld [vmem:[#allocation5 + $0x130] sm:$0xff]  ;;  %v65_v30 = vld [vmem:[#allocation5 + $0xb8] sm:$0xff] }
  0x23   :  { %218 = vmatprep.subr.mxu1 %v413_v0  ;;  %307 = vmatpush3.msra.mxu0 %v54_v14  ;;  %v50_v26 = vld [vmem:[#allocation5 + $0x40] sm:$0xff]  ;;  %v79_v31 = vld [vmem:[#allocation5 + $0x128] sm:$0xff]  ;;  %v49_v32 = vld [vmem:[#allocation5 + $0x38] sm:$0xff]  ;;  %p391_p0 = pnand %p390_p13, %p384_p10 }
  0x24   :  { %219 = vmatpush1.msra.mxu1 %v85_v10  ;;  %308 = vmatprep.subr.mxu0 %v69_v15  ;;  %v64_v33 = vld [vmem:[#allocation5 + $0xb0] sm:$0xff]  ;;  %v78_v34 = vld [vmem:[#allocation5 + $0x120] sm:$0xff]  ;;  %v63_v38 = vld [vmem:[#allocation5 + $0xa8] sm:$0xff] }
  0x25   :  { %220 = vmatprep.subr.mxu1 %v413_v0  ;;  %309 = vmatpush3.msra.mxu0 %v53_v17  ;;  %v48_v35 = vld [vmem:[#allocation5 + $0x30] sm:$0xff]  ;;  %v77_v39 = vld [vmem:[#allocation5 + $0x118] sm:$0xff]  ;;  %v47_v40 = vld [vmem:[#allocation5 + $0x28] sm:$0xff] }
  0x26   :  { %221 = vmatpush1.msra.mxu1 %v84_v13  ;;  %310 = vmatprep.subr.mxu0 %v68_v18  ;;  %v62_v41 = vld [vmem:[#allocation5 + $0xa0] sm:$0xff]  ;;  %v76_v42 = vld [vmem:[#allocation5 + $0x110] sm:$0xff]  ;;  %v61_v45 = vld [vmem:[#allocation5 + $0x98] sm:$0xff] }
  0x27   :  { %222 = vmatprep.subr.mxu1 %v413_v0  ;;  %311 = vmatpush3.msra.mxu0 %v52_v20  ;;  %v46_v43 = vld [vmem:[#allocation5 + $0x20] sm:$0xff]  ;;  %v41_v46 = vld [vmem:[#allocation2] sm:$0xff]  ;;  %v75_v47 = vld [vmem:[#allocation5 + $0x108] sm:$0xff] }
  0x28   :  { %223 = vmatpush1.msra.mxu1 %v83_v16  ;;  %312 = vmatprep.subr.mxu0 %v67_v21  ;;  %v45_v48 = vld [vmem:[#allocation5 + $0x18] sm:$0xff]  ;;  %v113_v49 = vcombine.high %v41_v46, %v41_v46  ;;  %v60_v50 = vld [vmem:[#allocation5 + $0x90] sm:$0xff]  ;;  %v74_v51 = vld [vmem:[#allocation5 + $0x100] sm:$0xff]  ;;  %v120_v53 = vrot.slane %v41_v46, %v119_v44 }
  0x29   :  { %224 = vmatprep.subr.mxu1 %v413_v0  ;;  %313 = vmatpush3.msra.mxu0 %v51_v23  ;;  %v44_v52 = vld [vmem:[#allocation5 + $0x10] sm:$0xff]  ;;  %v59_v54 = vld [vmem:[#allocation5 + $0x88] sm:$0xff]  ;;  %v58_v58 = vld [vmem:[#allocation5 + $0x80] sm:$0xff] }
  0x2a   :  { %225 = vmatpush1.msra.mxu1 %v82_v19  ;;  %314 = vmatprep.subr.mxu0 %v66_v24  ;;  %v104_v55 = vld [vmem:[#allocation5 + $0x1f0] sm:$0xf]  ;;  %v43_v56 = vld [vmem:[#allocation5 + $0x8] sm:$0xff]  ;;  %v127_v57 = vrot.slane %v113_v49, %v119_v44  ;;  %v42_v60 = vld [vmem:[#allocation5] sm:$0xff]  ;;  %v128_v61 = vcombine.high %v120_v53, %v120_v53 }
  0x2b   :  { %226 = vmatprep.subr.mxu1 %v413_v0  ;;  %315 = vmatpush3.msra.mxu0 %v50_v26  ;;  %v103_v59 = vld [vmem:[#allocation5 + $0x1e8] sm:$0xff]  ;;  %v102_v62 = vld [vmem:[#allocation5 + $0x1e0] sm:$0xff]  ;;  %v101_v1 = vld [vmem:[#allocation5 + $0x1d8] sm:$0xff] }
  0x2c   :  { %227 = vmatpush1.msra.mxu1 %v81_v22  ;;  %316 = vmatprep.subr.mxu0 %v65_v30  ;;  %v129_v63 = vcombine.high %v127_v57, %v127_v57  ;;  %v100_v2 = vld [vmem:[#allocation5 + $0x1d0] sm:$0xff]  ;;  %v99_v3 = vld [vmem:[#allocation5 + $0x1c8] sm:$0xff]  ;;  %v98_v4 = vld [vmem:[#allocation5 + $0x1c0] sm:$0xff] }
  0x2d   :  { %228 = vmatprep.subr.mxu1 %v413_v0  ;;  %317 = vmatpush3.msra.mxu0 %v49_v32  ;;  %v97_v5 = vld [vmem:[#allocation5 + $0x1b8] sm:$0xff]  ;;  %v96_v6 = vld [vmem:[#allocation5 + $0x1b0] sm:$0xff]  ;;  %v95_v7 = vld [vmem:[#allocation5 + $0x1a8] sm:$0xff] }
  0x2e   :  { %229 = vmatpush1.msra.mxu1 %v80_v25  ;;  %318 = vmatprep.subr.mxu0 %v64_v33  ;;  %v94_v8 = vld [vmem:[#allocation5 + $0x1a0] sm:$0xff]  ;;  %v93_v9 = vld [vmem:[#allocation5 + $0x198] sm:$0xff]  ;;  %v92_v10 = vld [vmem:[#allocation5 + $0x190] sm:$0xff] }
  0x2f   :  { %230 = vmatprep.subr.mxu1 %v413_v0  ;;  %319 = vmatpush3.msra.mxu0 %v48_v35  ;;  %v91_v11 = vld [vmem:[#allocation5 + $0x188] sm:$0xff]  ;;  %v90_v12 = vld [vmem:[#allocation5 + $0x180] sm:$0xff]  ;;  %v297_v16 = vld [vmem:[%s481_s2] ss:$0 sm:$0xff] }
  0x30   :  { %231 = vmatpush1.msra.mxu1 %v79_v31  ;;  %320 = vmatprep.subr.mxu0 %v63_v38 }
  0x31   :  { %232 = vmatprep.subr.mxu1 %v413_v0  ;;  %321 = vmatpush3.msra.mxu0 %v47_v40 }
  0x32   :  { %233 = vmatpush1.msra.mxu1 %v78_v34  ;;  %322 = vmatprep.subr.mxu0 %v62_v41 }
  0x33   :  { %234 = vmatprep.subr.mxu1 %v413_v0  ;;  %323 = vmatpush3.msra.mxu0 %v46_v43 }
  0x34   :  { %235 = vmatpush1.msra.mxu1 %v77_v39  ;;  %324 = vmatprep.subr.mxu0 %v61_v45 }
  0x35   :  { %236 = vmatprep.subr.mxu1 %v413_v0  ;;  %325 = vmatpush3.msra.mxu0 %v45_v48 }
  0x36   :  { %237 = vmatpush1.msra.mxu1 %v76_v42  ;;  %326 = vmatprep.subr.mxu0 %v60_v50 }
  0x37   :  { %238 = vmatprep.subr.mxu1 %v413_v0  ;;  %327 = vmatpush3.msra.mxu0 %v44_v52 }
  0x38   :  { %239 = vmatpush1.msra.mxu1 %v75_v47  ;;  %328 = vmatprep.subr.mxu0 %v59_v54 }
  0x39   :  { %240 = vmatprep.subr.mxu1 %v413_v0  ;;  %329 = vmatpush3.msra.mxu0 %v43_v56 }
  0x3a   :  { %241 = vmatpush1.msra.mxu1 %v74_v51  ;;  %330 = vmatprep.subr.mxu0 %v58_v58 }
  0x3b   :  { %244 = vmatprep.subr.mxu1 %v413_v0  ;;  %331 = vmatpush3.msra.mxu0 %v42_v60 }
  0x3c   :  { %298 = vmatpush2.msk.msra.mxu1 %vm136_vm0, %v104_v55  ;;  %204 = vmatprep.mubr.f32.mxu0 %v128_v61 }
  0x3d   :  { %246 = vmatprep.subr.mxu1 %v413_v0  ;;  %205 = vmatmul.mubr.f32.vlgmr.msra.gmra.mxu0 %v120_v53 }
  0x3e   :  { %247 = vmatpush2.msra.mxu1 %v103_v59  ;;  %299 = vmatprep.mubr.msk.f32.mxu1 %vm133_vm1, %v129_v63 }
  0x3f   :  { %248 = vmatprep.subr.mxu1 %v413_v0 }
  0x40   :  { %249 = vmatpush2.msra.mxu1 %v102_v62 }
  0x41   :  { %250 = vmatprep.subr.mxu1 %v413_v0 }
  0x42   :  { %251 = vmatpush2.msra.mxu1 %v101_v1 }
  0x43   :  { %252 = vmatprep.subr.mxu1 %v413_v0 }
  0x44   :  { %253 = vmatpush2.msra.mxu1 %v100_v2 }
  0x45   :  { %254 = vmatprep.subr.mxu1 %v413_v0 }
  0x46   :  { %255 = vmatpush2.msra.mxu1 %v99_v3 }
  0x47   :  { %256 = vmatprep.subr.mxu1 %v413_v0 }
  0x48   :  { %257 = vmatpush2.msra.mxu1 %v98_v4 }
  0x49   :  { %258 = vmatprep.subr.mxu1 %v413_v0 }
  0x4a   :  { %259 = vmatpush2.msra.mxu1 %v97_v5 }
  0x4b   :  { %260 = vmatprep.subr.mxu1 %v413_v0 }
  0x4c   :  { %261 = vmatpush2.msra.mxu1 %v96_v6 }
  0x4d   :  { %262 = vmatprep.subr.mxu1 %v413_v0 }
  0x4e   :  { %263 = vmatpush2.msra.mxu1 %v95_v7 }
  0x4f   :  { %264 = vmatprep.subr.mxu1 %v413_v0 }
  0x50   :  { %265 = vmatpush2.msra.mxu1 %v94_v8 }
  0x51   :  { %266 = vmatprep.subr.mxu1 %v413_v0 }
  0x52   :  { %267 = vmatpush2.msra.mxu1 %v93_v9 }
  0x53   :  { %268 = vmatprep.subr.mxu1 %v413_v0 }
  0x54   :  { %269 = vmatpush2.msra.mxu1 %v92_v10 }
  0x55   :  { %270 = vmatprep.subr.mxu1 %v413_v0 }
  0x56   :  { %271 = vmatpush2.msra.mxu1 %v91_v11 }
  0x57   :  { %272 = vmatprep.subr.mxu1 %v413_v0 }
  0x58   :  { %273 = vmatpush2.msra.mxu1 %v90_v12 }
  0x59   :  { %275 = vmatmul.mubr.f32.vlgmr.msra.gmra.mxu1 %v127_v57 }
  0xfd   :  { %v332_v13 = vpop.f32.mrf.mxu0 }
  0xff   :  { %v333_v14 = vpop.f32.mrf.mxu0 }
 0x100   :  { %v334_v15 = vadd.f32 %v333_v14, %v332_v13 }
 0x102   :  { %v207_v17 = vadd.f32 %v334_v15, %v297_v16 }
 0x119   :  { %v276_v18 = vpop.f32.mrf.mxu1 }
 0x11a   :  { %v277_v19 = vadd.f32 %v276_v18, %v207_v17 }
 0x11b   :  { %v278_v20 = vpop.f32.mrf.mxu1 }
 0x11c   :  { %280 = vst [vmem:[#allocation7] sm:$0x3] %v277_v19 }
 0x11d   :  { %394 = shalt.err (!%p391_p0)
}
 0x11e   :  { %290 = dma.vmem_to_hbm [thread:$0]  %s288_s25, 32, %s482_s3, [#allocation4]  }
 0x11f   :  { %407 = dma.done.wait [#allocation4], 32  }
 0x120   :  { %408 = vsyncadd [#allocation4], 4294967264 }
 0x121   :  { %294 = vsyncpa [#allocation3], 1 }
 0x122   :  { %295 = vsyncpa [#allocation6], 1 }
 0x123   :  { %296 = vsyncpa [#allocation4], 1 }

</bundles_post_ra>
